<compile_context>
chip_gen: v6e
topology: v6e:2x2x1
jax: 0.10.0
libtpu: 0.0.40
codegen_flags: <defaults>
</compile_context>

<pallas_src>
import functools
import numpy as np
import jax
import jax.numpy as jnp
from jax import lax
from jax.experimental import pallas as pl
from jax.experimental.pallas import tpu as pltpu


def _bilinear_matrix(out_size, in_size, scale):
    """Interpolation matrix matching F.interpolate(mode='bilinear', align_corners=False)."""
    m = np.zeros((out_size, in_size), dtype=np.float32)
    for o in range(out_size):
        src = (o + 0.5) / scale - 0.5
        src = max(src, 0.0)
        i0 = min(int(np.floor(src)), in_size - 1)
        i1 = min(i0 + 1, in_size - 1)
        w1 = src - i0
        m[o, i0] += 1.0 - w1
        m[o, i1] += w1
    return m


def _head_kernel(x_ref, w_ref, b_ref, *rest, H, W, C, Ho, Wo, upsample):
    # x_ref:   (1, C, H*W)   one batch element, NCHW flattened over space
    # w_ref:   (9, C)        3x3 conv taps, row `tap = 3*dy + dx`
    # b_ref:   (1,)  SMEM    conv bias
    # [wh_ref: (Ho, H)   row interpolation matrix             ]  only when
    # [wwt_ref:(W, Wo)   col interpolation matrix, transposed ]  upsample=True
    # o_ref:   (1, Ho, Wo)
    # acc_ref: (H+2, W+2)    VMEM scratch: conv accumulator with 1-px halo
    if upsample:
        wh_ref, wwt_ref, o_ref, acc_ref = rest
    else:
        o_ref, acc_ref = rest

    # All 9 taps in a single MXU matmul; large dim (H*W) sits on lanes.
    z = jnp.dot(w_ref[...], x_ref[0], preferred_element_type=jnp.float32)   # (9, H*W)
    z = z.reshape(9, H, W)

    # Scatter the 9 tap planes into the halo-padded accumulator:
    #   z[tap, p, q] contributes to conv_out[p + 1 - dy, q + 1 - dx];
    #   acc_ref holds conv_out at offset (+1, +1), so the contribution lands at
    #   acc_ref[p + 2 - dy, q + 2 - dx]. Out-of-range contributions fall into
    #   the discarded border, reproducing Conv2d zero-padding semantics.
    acc_ref[...] = jnp.zeros_like(acc_ref)
    for tap in range(9):
        dy, dx = tap // 3, tap % 3
        acc_ref[2 - dy:2 - dy + H, 2 - dx:2 - dx + W] += z[tap]

    # Bias + sigmoid in lane-dense (H, W) layout.
    y = jax.nn.sigmoid(acc_ref[1:1 + H, 1:1 + W] + b_ref[0])                # (H, W)

    if upsample:
        # Bilinear upsample (align_corners=False) as two matmuls: Wh @ y @ Ww^T.
        t = jnp.dot(wh_ref[...], y, preferred_element_type=jnp.float32)      # (Ho, W)
        o_ref[0] = jnp.dot(t, wwt_ref[...], preferred_element_type=jnp.float32)
    else:
        o_ref[0] = y


def newcrfs_disp_head(x_nchw, w_oihw, bias, scale):
    """x_nchw: (B, C, H, W); w_oihw: (1, C, 3, 3); bias: (1,). Returns (B, 1, Ho, Wo)."""
    B, C, H, W = x_nchw.shape
    scale = int(scale)
    do_up = scale > 1
    Ho, Wo = (H * scale, W * scale) if do_up else (H, W)

    # Metadata-only reshape of contiguous NCHW -> (B, C, H*W): no pad, no transpose.
    x_flat = x_nchw.reshape(B, C, H * W).astype(jnp.float32)
    w_taps = jnp.transpose(w_oihw[0], (1, 2, 0)).reshape(9, C).astype(jnp.float32)
    b_smem = jnp.asarray(bias, jnp.float32).reshape(1)

    inputs = [x_flat, w_taps, b_smem]
    in_specs = [
        pl.BlockSpec((1, C, H * W), lambda b: (b, 0, 0)),
        pl.BlockSpec((9, C), lambda b: (0, 0)),
        pl.BlockSpec(memory_space=pltpu.MemorySpace.SMEM),
    ]
    if do_up:
        wh = jnp.asarray(_bilinear_matrix(Ho, H, scale))        # (Ho, H)
        wwt = jnp.asarray(_bilinear_matrix(Wo, W, scale)).T     # (W, Wo)
        inputs += [wh, wwt]
        in_specs += [
            pl.BlockSpec((Ho, H), lambda b: (0, 0)),
            pl.BlockSpec((W, Wo), lambda b: (0, 0)),
        ]

    kernel = functools.partial(_head_kernel, H=H, W=W, C=C, Ho=Ho, Wo=Wo,
                               upsample=do_up)

    # TODO(synk): for very large NeWCRFs feature maps (v7x 64 MiB VMEM) add a
    # spatial row-tile grid axis (second "parallel" axis) instead of one
    # whole-image block per batch element.
    out = pl.pallas_call(
        kernel,
        out_shape=jax.ShapeDtypeStruct((B, Ho, Wo), jnp.float32),
        grid_spec=pltpu.PrefetchScalarGridSpec(
            num_scalar_prefetch=0,
            grid=(B,),
            in_specs=in_specs,
            out_specs=pl.BlockSpec((1, Ho, Wo), lambda b: (b, 0, 0)),
            scratch_shapes=[pltpu.VMEM((H + 2, W + 2), jnp.float32)],
        ),
        compiler_params=pltpu.CompilerParams(
            dimension_semantics=("parallel",),
            vmem_limit_bytes=64 * 1024 * 1024,
        ),
    )(*inputs)

    return out[:, None, :, :]   # NCHW: (B, 1, Ho, Wo)


if __name__ == "__main__":
    key = jax.random.PRNGKey(0)
    B, C, H, W = 2, 32, 16, 16     # input_dim = 32 (small, consistent with module)
    scale = 2

    k1, k2, k3 = jax.random.split(key, 3)
    x = jax.random.normal(k1, (B, C, H, W), jnp.float32)
    # Deterministic synthetic params (Conv2d default-init-like uniform bounds).
    bound = 1.0 / np.sqrt(C * 9)
    w = jax.random.uniform(k2, (1, C, 3, 3), jnp.float32, -bound, bound)
    b = jax.random.uniform(k3, (1,), jnp.float32, -bound, bound)

    out2 = jax.block_until_ready(newcrfs_disp_head(x, w, b, scale))   # upsample path
    out1 = jax.block_until_ready(newcrfs_disp_head(x, w, b, 1))       # scale == 1 path

    # Pure-JAX reference for correctness sanity check.
    y = lax.conv_general_dilated(x, w, (1, 1), 'SAME',
                                 dimension_numbers=('NCHW', 'OIHW', 'NCHW'))
    y = jax.nn.sigmoid(y + b.reshape(1, 1, 1, 1))
    wh = jnp.asarray(_bilinear_matrix(H * scale, H, scale))
    ww = jnp.asarray(_bilinear_matrix(W * scale, W, scale))
    ref2 = jnp.einsum('oh,bchw->bcow', wh, y)
    ref2 = jnp.einsum('pw,bcow->bcop', ww, ref2)

    assert out2.shape == (B, 1, H * scale, W * scale)
    assert out1.shape == (B, 1, H, W)
    np.testing.assert_allclose(np.asarray(out2), np.asarray(ref2), rtol=1e-4, atol=1e-5)
    np.testing.assert_allclose(np.asarray(out1), np.asarray(y), rtol=1e-4, atol=1e-5)
    print("KERNEL_OK")
</pallas_src>

<mosaic_0001>
module attributes {stable_mosaic.version = 11 : i64} {
  func.func @_head_kernel(%arg0: i32, %arg1: memref<1x32x256xf32, #tpu.memory_space<vmem>>, %arg2: memref<9x32xf32, #tpu.memory_space<vmem>>, %arg3: memref<1xf32, #tpu.memory_space<smem>>, %arg4: memref<32x16xf32, #tpu.memory_space<vmem>>, %arg5: memref<16x32xf32, #tpu.memory_space<vmem>>, %arg6: memref<1x32x32xf32, #tpu.memory_space<vmem>>, %arg7: memref<18x18xf32, #tpu.memory_space<vmem>>) attributes {dimension_semantics = [#tpu.dimension_semantics<parallel>], iteration_bounds = array<i64: 2>, scalar_prefetch = 0 : i64, scratch_operands = 1 : i64, tpu.core_type = #tpu.core_type<tc>, window_params = [{transform_indices = @transform_0, window_bounds = array<i64: 1, 32, 256>}, {pipeline_mode = #tpu.pipeline_mode<synchronous>, transform_indices = @transform_1, window_bounds = array<i64: 9, 32>}, {transform_indices = @transform_2, window_bounds = array<i64: 1>}, {pipeline_mode = #tpu.pipeline_mode<synchronous>, transform_indices = @transform_3, window_bounds = array<i64: 32, 16>}, {pipeline_mode = #tpu.pipeline_mode<synchronous>, transform_indices = @transform_4, window_bounds = array<i64: 16, 32>}, {transform_indices = @transform_5, window_bounds = array<i64: 1, 32, 32>}]} {
    %c0 = arith.constant 0 : index
    %c0_0 = arith.constant 0 : index
    %0 = vector.load %arg2[%c0, %c0_0] : memref<9x32xf32, #tpu.memory_space<vmem>>, vector<9x32xf32>
    %c0_1 = arith.constant 0 : index
    %c0_2 = arith.constant 0 : index
    %c0_3 = arith.constant 0 : index
    %1 = vector.load %arg1[%c0_1, %c0_2, %c0_3] : memref<1x32x256xf32, #tpu.memory_space<vmem>>, vector<1x32x256xf32>
    %2 = vector.shape_cast %1 : vector<1x32x256xf32> to vector<32x256xf32>
    %cst = arith.constant dense<0.000000e+00> : vector<9x256xf32>
    %3 = tpu.matmul %0, %2, %cst {dimension_numbers = #tpu.dot_dimension_numbers<[1], [0], [0], [1], [0, 0, 1, 1], [], []>} : vector<9x32xf32>, vector<32x256xf32>, vector<9x256xf32> -> vector<9x256xf32>
    %4 = vector.shape_cast %3 : vector<9x256xf32> to vector<9x16x16xf32>
    %cst_4 = arith.constant 0.000000e+00 : f32
    %5 = vector.broadcast %cst_4 : f32 to vector<18x18xf32>
    %c0_5 = arith.constant 0 : index
    %c0_6 = arith.constant 0 : index
    %6 = vector.load %arg7[%c0_5, %c0_6] : memref<18x18xf32, #tpu.memory_space<vmem>>, vector<18x18xf32>
    tpu.vector_store %arg7[%c0_5, %c0_6], %5 {strides = array<i32>} : memref<18x18xf32, #tpu.memory_space<vmem>>, vector<18x18xf32>,
    %c2 = arith.constant 2 : index
    %c2_7 = arith.constant 2 : index
    %7 = vector.load %arg7[%c2, %c2_7] : memref<18x18xf32, #tpu.memory_space<vmem>>, vector<16x16xf32>
    %8 = vector.extract_strided_slice %4 {offsets = [0, 0, 0], sizes = [1, 16, 16], strides = [1, 1, 1]} : vector<9x16x16xf32> to vector<1x16x16xf32>
    %9 = vector.shape_cast %8 : vector<1x16x16xf32> to vector<16x16xf32>
    %10 = arith.addf %7, %9 : vector<16x16xf32>
    %c2_8 = arith.constant 2 : index
    %c2_9 = arith.constant 2 : index
    %11 = vector.load %arg7[%c2_8, %c2_9] : memref<18x18xf32, #tpu.memory_space<vmem>>, vector<16x16xf32>
    tpu.vector_store %arg7[%c2_8, %c2_9], %10 {strides = array<i32>} : memref<18x18xf32, #tpu.memory_space<vmem>>, vector<16x16xf32>,
    %c2_10 = arith.constant 2 : index
    %c1 = arith.constant 1 : index
    %12 = vector.load %arg7[%c2_10, %c1] : memref<18x18xf32, #tpu.memory_space<vmem>>, vector<16x16xf32>
    %13 = vector.extract_strided_slice %4 {offsets = [1, 0, 0], sizes = [1, 16, 16], strides = [1, 1, 1]} : vector<9x16x16xf32> to vector<1x16x16xf32>
    %14 = vector.shape_cast %13 : vector<1x16x16xf32> to vector<16x16xf32>
    %15 = arith.addf %12, %14 : vector<16x16xf32>
    %c2_11 = arith.constant 2 : index
    %c1_12 = arith.constant 1 : index
    %16 = vector.load %arg7[%c2_11, %c1_12] : memref<18x18xf32, #tpu.memory_space<vmem>>, vector<16x16xf32>
    tpu.vector_store %arg7[%c2_11, %c1_12], %15 {strides = array<i32>} : memref<18x18xf32, #tpu.memory_space<vmem>>, vector<16x16xf32>,
    %c2_13 = arith.constant 2 : index
    %c0_14 = arith.constant 0 : index
    %17 = vector.load %arg7[%c2_13, %c0_14] : memref<18x18xf32, #tpu.memory_space<vmem>>, vector<16x16xf32>
    %18 = vector.extract_strided_slice %4 {offsets = [2, 0, 0], sizes = [1, 16, 16], strides = [1, 1, 1]} : vector<9x16x16xf32> to vector<1x16x16xf32>
    %19 = vector.shape_cast %18 : vector<1x16x16xf32> to vector<16x16xf32>
    %20 = arith.addf %17, %19 : vector<16x16xf32>
    %c2_15 = arith.constant 2 : index
    %c0_16 = arith.constant 0 : index
    %21 = vector.load %arg7[%c2_15, %c0_16] : memref<18x18xf32, #tpu.memory_space<vmem>>, vector<16x16xf32>
    tpu.vector_store %arg7[%c2_15, %c0_16], %20 {strides = array<i32>} : memref<18x18xf32, #tpu.memory_space<vmem>>, vector<16x16xf32>,
    %c1_17 = arith.constant 1 : index
    %c2_18 = arith.constant 2 : index
    %22 = vector.load %arg7[%c1_17, %c2_18] : memref<18x18xf32, #tpu.memory_space<vmem>>, vector<16x16xf32>
    %23 = vector.extract_strided_slice %4 {offsets = [3, 0, 0], sizes = [1, 16, 16], strides = [1, 1, 1]} : vector<9x16x16xf32> to vector<1x16x16xf32>
    %24 = vector.shape_cast %23 : vector<1x16x16xf32> to vector<16x16xf32>
    %25 = arith.addf %22, %24 : vector<16x16xf32>
    %c1_19 = arith.constant 1 : index
    %c2_20 = arith.constant 2 : index
    %26 = vector.load %arg7[%c1_19, %c2_20] : memref<18x18xf32, #tpu.memory_space<vmem>>, vector<16x16xf32>
    tpu.vector_store %arg7[%c1_19, %c2_20], %25 {strides = array<i32>} : memref<18x18xf32, #tpu.memory_space<vmem>>, vector<16x16xf32>,
    %c1_21 = arith.constant 1 : index
    %c1_22 = arith.constant 1 : index
    %27 = vector.load %arg7[%c1_21, %c1_22] : memref<18x18xf32, #tpu.memory_space<vmem>>, vector<16x16xf32>
    %28 = vector.extract_strided_slice %4 {offsets = [4, 0, 0], sizes = [1, 16, 16], strides = [1, 1, 1]} : vector<9x16x16xf32> to vector<1x16x16xf32>
    %29 = vector.shape_cast %28 : vector<1x16x16xf32> to vector<16x16xf32>
    %30 = arith.addf %27, %29 : vector<16x16xf32>
    %c1_23 = arith.constant 1 : index
    %c1_24 = arith.constant 1 : index
    %31 = vector.load %arg7[%c1_23, %c1_24] : memref<18x18xf32, #tpu.memory_space<vmem>>, vector<16x16xf32>
    tpu.vector_store %arg7[%c1_23, %c1_24], %30 {strides = array<i32>} : memref<18x18xf32, #tpu.memory_space<vmem>>, vector<16x16xf32>,
    %c1_25 = arith.constant 1 : index
    %c0_26 = arith.constant 0 : index
    %32 = vector.load %arg7[%c1_25, %c0_26] : memref<18x18xf32, #tpu.memory_space<vmem>>, vector<16x16xf32>
    %33 = vector.extract_strided_slice %4 {offsets = [5, 0, 0], sizes = [1, 16, 16], strides = [1, 1, 1]} : vector<9x16x16xf32> to vector<1x16x16xf32>
    %34 = vector.shape_cast %33 : vector<1x16x16xf32> to vector<16x16xf32>
    %35 = arith.addf %32, %34 : vector<16x16xf32>
    %c1_27 = arith.constant 1 : index
    %c0_28 = arith.constant 0 : index
    %36 = vector.load %arg7[%c1_27, %c0_28] : memref<18x18xf32, #tpu.memory_space<vmem>>, vector<16x16xf32>
    tpu.vector_store %arg7[%c1_27, %c0_28], %35 {strides = array<i32>} : memref<18x18xf32, #tpu.memory_space<vmem>>, vector<16x16xf32>,
    %c0_29 = arith.constant 0 : index
    %c2_30 = arith.constant 2 : index
    %37 = vector.load %arg7[%c0_29, %c2_30] : memref<18x18xf32, #tpu.memory_space<vmem>>, vector<16x16xf32>
    %38 = vector.extract_strided_slice %4 {offsets = [6, 0, 0], sizes = [1, 16, 16], strides = [1, 1, 1]} : vector<9x16x16xf32> to vector<1x16x16xf32>
    %39 = vector.shape_cast %38 : vector<1x16x16xf32> to vector<16x16xf32>
    %40 = arith.addf %37, %39 : vector<16x16xf32>
    %c0_31 = arith.constant 0 : index
    %c2_32 = arith.constant 2 : index
    %41 = vector.load %arg7[%c0_31, %c2_32] : memref<18x18xf32, #tpu.memory_space<vmem>>, vector<16x16xf32>
    tpu.vector_store %arg7[%c0_31, %c2_32], %40 {strides = array<i32>} : memref<18x18xf32, #tpu.memory_space<vmem>>, vector<16x16xf32>,
    %c0_33 = arith.constant 0 : index
    %c1_34 = arith.constant 1 : index
    %42 = vector.load %arg7[%c0_33, %c1_34] : memref<18x18xf32, #tpu.memory_space<vmem>>, vector<16x16xf32>
    %43 = vector.extract_strided_slice %4 {offsets = [7, 0, 0], sizes = [1, 16, 16], strides = [1, 1, 1]} : vector<9x16x16xf32> to vector<1x16x16xf32>
    %44 = vector.shape_cast %43 : vector<1x16x16xf32> to vector<16x16xf32>
    %45 = arith.addf %42, %44 : vector<16x16xf32>
    %c0_35 = arith.constant 0 : index
    %c1_36 = arith.constant 1 : index
    %46 = vector.load %arg7[%c0_35, %c1_36] : memref<18x18xf32, #tpu.memory_space<vmem>>, vector<16x16xf32>
    tpu.vector_store %arg7[%c0_35, %c1_36], %45 {strides = array<i32>} : memref<18x18xf32, #tpu.memory_space<vmem>>, vector<16x16xf32>,
    %c0_37 = arith.constant 0 : index
    %c0_38 = arith.constant 0 : index
    %47 = vector.load %arg7[%c0_37, %c0_38] : memref<18x18xf32, #tpu.memory_space<vmem>>, vector<16x16xf32>
    %48 = vector.extract_strided_slice %4 {offsets = [8, 0, 0], sizes = [1, 16, 16], strides = [1, 1, 1]} : vector<9x16x16xf32> to vector<1x16x16xf32>
    %49 = vector.shape_cast %48 : vector<1x16x16xf32> to vector<16x16xf32>
    %50 = arith.addf %47, %49 : vector<16x16xf32>
    %c0_39 = arith.constant 0 : index
    %c0_40 = arith.constant 0 : index
    %51 = vector.load %arg7[%c0_39, %c0_40] : memref<18x18xf32, #tpu.memory_space<vmem>>, vector<16x16xf32>
    tpu.vector_store %arg7[%c0_39, %c0_40], %50 {strides = array<i32>} : memref<18x18xf32, #tpu.memory_space<vmem>>, vector<16x16xf32>,
    %c1_41 = arith.constant 1 : index
    %c1_42 = arith.constant 1 : index
    %52 = vector.load %arg7[%c1_41, %c1_42] : memref<18x18xf32, #tpu.memory_space<vmem>>, vector<16x16xf32>
    %c0_43 = arith.constant 0 : index
    %53 = memref.load %arg3[%c0_43] : memref<1xf32, #tpu.memory_space<smem>>
    %54 = vector.broadcast %53 : f32 to vector<16x16xf32>
    %55 = arith.addf %52, %54 : vector<16x16xf32>
    %56 = arith.negf %55 : vector<16x16xf32>
    %57 = math.exp %56 : vector<16x16xf32>
    %cst_44 = arith.constant 1.000000e+00 : f32
    %58 = vector.broadcast %cst_44 : f32 to vector<16x16xf32>
    %59 = arith.addf %58, %57 : vector<16x16xf32>
    %60 = arith.divf %58, %59 : vector<16x16xf32>
    %c0_45 = arith.constant 0 : index
    %c0_46 = arith.constant 0 : index
    %61 = vector.load %arg4[%c0_45, %c0_46] : memref<32x16xf32, #tpu.memory_space<vmem>>, vector<32x16xf32>
    %cst_47 = arith.constant dense<0.000000e+00> : vector<32x16xf32>
    %62 = tpu.matmul %61, %60, %cst_47 {dimension_numbers = #tpu.dot_dimension_numbers<[1], [0], [0], [1], [0, 0, 1, 1], [], []>} : vector<32x16xf32>, vector<16x16xf32>, vector<32x16xf32> -> vector<32x16xf32>
    %c0_48 = arith.constant 0 : index
    %c0_49 = arith.constant 0 : index
    %63 = vector.load %arg5[%c0_48, %c0_49] : memref<16x32xf32, #tpu.memory_space<vmem>>, vector<16x32xf32>
    %cst_50 = arith.constant dense<0.000000e+00> : vector<32x32xf32>
    %64 = tpu.matmul %62, %63, %cst_50 {dimension_numbers = #tpu.dot_dimension_numbers<[1], [0], [0], [1], [0, 0, 1, 1], [], []>} : vector<32x16xf32>, vector<16x32xf32>, vector<32x32xf32> -> vector<32x32xf32>
    %c0_51 = arith.constant 0 : index
    %c0_52 = arith.constant 0 : index
    %c0_53 = arith.constant 0 : index
    %65 = vector.load %arg6[%c0_51, %c0_52, %c0_53] : memref<1x32x32xf32, #tpu.memory_space<vmem>>, vector<1x32x32xf32>
    %66 = vector.shape_cast %65 : vector<1x32x32xf32> to vector<32x32xf32>
    %67 = vector.shape_cast %64 : vector<32x32xf32> to vector<1x32x32xf32>
    tpu.vector_store %arg6[%c0_51, %c0_52, %c0_53], %67 {strides = array<i32>} : memref<1x32x32xf32, #tpu.memory_space<vmem>>, vector<1x32x32xf32>,
    return
  }
  func.func @transform_0(%arg0: i32) -> (i32, i32, i32) {
    %c0_i32 = arith.constant 0 : i32
    %c0_i32_0 = arith.constant 0 : i32
    %c0_i32_1 = arith.constant 0 : i32
    return %arg0, %c0_i32, %c0_i32_0 : i32, i32, i32
  }
  func.func @transform_1(%arg0: i32) -> (i32, i32) {
    %c0_i32 = arith.constant 0 : i32
    %c0_i32_0 = arith.constant 0 : i32
    %c0_i32_1 = arith.constant 0 : i32
    return %c0_i32, %c0_i32_0 : i32, i32
  }
  func.func @transform_2(%arg0: i32) -> i32 {
    %c0_i32 = arith.constant 0 : i32
    %c0_i32_0 = arith.constant 0 : i32
    return %c0_i32 : i32
  }
  func.func @transform_3(%arg0: i32) -> (i32, i32) {
    %c0_i32 = arith.constant 0 : i32
    %c0_i32_0 = arith.constant 0 : i32
    %c0_i32_1 = arith.constant 0 : i32
    return %c0_i32, %c0_i32_0 : i32, i32
  }
  func.func @transform_4(%arg0: i32) -> (i32, i32) {
    %c0_i32 = arith.constant 0 : i32
    %c0_i32_0 = arith.constant 0 : i32
    %c0_i32_1 = arith.constant 0 : i32
    return %c0_i32, %c0_i32_0 : i32, i32
  }
  func.func @transform_5(%arg0: i32) -> (i32, i32, i32) {
    %c0_i32 = arith.constant 0 : i32
    %c0_i32_0 = arith.constant 0 : i32
    %c0_i32_1 = arith.constant 0 : i32
    return %arg0, %c0_i32, %c0_i32_0 : i32, i32, i32
  }
}

</mosaic_0001>

<bundles_post_ra>
// kernel: tpu_custom_call.1
= control target key start
LH: loop header
LB: loop body
LE: loop exit
PB: predicated region body
PF: predicated region fallthrough
CT: control target
= control target key end

     0   :  { %s1902_s0 = inlined_call_operand.hbm [shape: f32[2,32,256], index: 0, kind: input, shape index: {}]   ;;  %s1903_s1 = inlined_call_operand.vmem [shape: f32[9,32], index: 1, kind: input, shape index: {}]   ;;  %s1904_s2 = inlined_call_operand.<no memory space> [shape: f32[1], index: 2, kind: input, shape index: {}]   ;;  %s1905_s3 = inlined_call_operand.vmem [shape: f32[32,16], index: 3, kind: input, shape index: {}]   ;;  %s1906_s4 = inlined_call_operand.vmem [shape: f32[16,32], index: 4, kind: input, shape index: {}]   ;;  %s1907_s5 = inlined_call_operand.hbm [shape: f32[2,32,32], index: 5, kind: output, shape index: {}]  }
   0x1   :  { %10 = sst [smem:[#allocation3]] %s1904_s2 }
   0x2   :  { %11 = vsyncpa [#allocation5], 0 }
   0x3   :  { %13 = vsyncpa [#allocation5 + $0x1], 0 }
   0x4   :  { %14 = vsyncpa [#allocation6], 0 }
   0x5   :  { %16 = vsyncpa [#allocation6 + $0x1], 0  ;;  %s1500_s20 = smov 0   ;;  %s1502_s21 = smov 0  }
   0x6   :  { %s1504_s22 = smov 0   ;;  %s1506_s23 = smov 0  }
   0x7 LB: > { %s1521_s2 = sadd.s32 4294967295, %s1446_s23   ;;  %s1223_s24 = sadd.s32 4294967294, %s1446_s23   ;;  %s1446_s23 = sphi %s1506_s23, %s1922_s23   ;;  %s1442_s22 = sphi %s1504_s22, %s1921_s22   ;;  %s1438_s21 = sphi %s1502_s21, %s1920_s21   ;;  %s1434_s20 = sphi %s1500_s20, %s1919_s20  }
   0x8   : > { %s1525_s25 = sadd.s32 1, %s1446_s23   ;;  %s29_s26 = sadd.s32 1, %s1442_s22 }
   0x9   : > { %s26_s27 = ssub.s32 %s1446_s23, %s1525_s25  ;;  %p36_p0 = scmp.ne.s32.totalorder %s1442_s22, %s1438_s21 }
   0xa   : > { %p27_p1 = scmp.eq.s32.totalorder %s26_s27, 0  ;;  %p37_p2 = scmp.eq.s32.totalorder %s1446_s23, 0 }
   0xb   : > { %p42_p3 = scmp.ne.s32.totalorder %s1438_s21, %s1434_s20  ;;  %p43_p4 = scmp.eq.s32.totalorder %s1521_s2, 0 }
   0xc   : > { %s1537_s28 = scalar_select %p27_p1, %s1442_s22, %s29_s26  }
   0xd   : > { %p1539_p5 = por %p37_p2, %p36_p0  ;;  %p1543_p6 = por %p43_p4, %p42_p3 }
   0xe   : > { %p150_p7 = scmp.eq.s32.totalorder %s1521_s2, 1  ;;  %p156_p8 = scmp.eq.s32.totalorder %s1223_s24, 1 }
   0xf   : > { %s1911_s30 = scalar_select %p1543_p6, 1, 0 }
  0x10   : > { %p1295_p10 = scmp.lt.s32.totalorder %s1446_s23, 2  ;;  %p1550_p11 = por %p150_p7, %p36_p0 }
  0x11   : > { %p1554_p12 = por %p156_p8, %p42_p3  ;;  %s188_s8 = sand.u32 1, %s1442_s22  }
  0x12   : > { %s1912_s6 = scalar_select %p1550_p11, 1, 0 }
  0x13   : > { %s1913_s7 = scalar_select %p1554_p12, 1, 0 }
  0x14   : > { %s1249_s9 = sshll.u32 %s1446_s23, 10  ;;  %s1226_s10 = sshll.u32 %s188_s8, 6 }
  0x15   : > { %s1563_s13 = scalar_lea.hbm %s1902_s0, %s1249_s9  ;;  %s192_s14 = scalar_lea.vmem [#allocation4], %s1226_s10 }
  0x16   : > { %s199_s15 = sshll.u32 %s192_s14, 4  ;;  %p1567_p13 = pnand %p1295_p10, %p1539_p5  ;;  %s1571_s15 = int_to_ptr.vmem [resolvable:$true] %s199_s15 }
  0x17   : > { %s1573_s17 = scalar_lea.sflag [#allocation5], %s188_s8  ;;  %s1354_s18 = scalar_lea.hbm %s1563_s13, 1024 }
  0x18   : > { %p1355_p0 = scmp.ne.s32.totalorder %s1563_s13, %s1354_s18  ;;  %p1356_p1 = pneg %p1567_p13 }
  0x19   : > { %s1359_s26 = scalar_lea.hbm %s1902_s0, 2048  ;;  %p1360_p4 = scmp.lt.s32.totalorder %s1563_s13, %s1902_s0 }
  0x1a   : > { %p1357_p2 = pnand %p1356_p1, %p1355_p0  ;;  %p1361_p5 = scmp.lt.s32.totalorder %s1359_s26, %s1354_s18 }
  0x1c   : > { %p1358_p3 = pneg %p1357_p2  ;;  %p1362_p7 = por %p1361_p5, %p1360_p4 }
  0x1e   : > { %p1363_p8 = pnand %p1362_p7, %p1358_p3 }
  0x20   : > { %1366 = shalt.err (!%p1363_p8)
}
  0x21   : > { %s1367_s8 = scalar_lea.vmem %s1571_s15, 1024  ;;  %s1448_s9 = smov [#allocation4]  }
  0x22   : > { %p1368_p10 = scmp.ne.s32.totalorder %s1571_s15, %s1367_s8  ;;  %s1372_s10 = sshll.u32 %s1448_s9, 4  ;;  %s1373_s10 = int_to_ptr.vmem [resolvable:$false] %s1372_s10 }
  0x23   : > { %s1374_s11 = scalar_lea.vmem %s1373_s10, 2048  ;;  %p1375_p2 = scmp.lt.s32.totalorder %s1571_s15, %s1373_s10 }
  0x24   : > { %p1370_p9 = pnand %p1368_p10, %p1356_p1  ;;  %p1376_p12 = scmp.lt.s32.totalorder %s1374_s11, %s1367_s8 }
  0x26   : > { %p1371_p0 = pneg %p1370_p9  ;;  %p1377_p11 = por %p1376_p12, %p1375_p2 }
  0x28   : > { %p1378_p6 = pnand %p1377_p11, %p1371_p0 }
  0x2a   : > { %1381 = shalt.err (!%p1378_p6)
}
  0x2b   : > { %s1449_s12 = smov 256   ;;  %s1450_s14 = smov 16  }
  0x2c   : > { %1290 = dma.hbm_to_vmem [thread:$0]  (!%p1567_p13), %s1563_s13, 1024, %s1571_s15, %s1573_s17, %s1449_s12, %s1449_s12, %s1450_s14  }
  0x2d   : > { %p1229_p9 = scmp.ge.s32.totalorder %s1446_s23, 1  ;;  %p207_p1 = scmp.lt.s32.totalorder %s1446_s23, 3 }
  0x2f   : > { %p208_p3 = pnand %p1229_p9, %p207_p1 }
  0x30   : > { %s1597_s18 = sand.u32 (!%p208_p3), 1, %s1438_s21   ;;  %p1915_p6 = scmp.ne.s32.totalorder (!%p208_p3), %s1911_s30, 0 }
  0x31   : > { %211 = sbr.rel (%p208_p3) target bundleno = 1173 (0x495), region = 40  ;;  %s1230_s19 = sshll.u32 (!%p208_p3), %s1597_s18, 6 }
  0x32   : > { %s214_s24 = scalar_lea.sflag (!%p208_p3), [#allocation5], %s1597_s18  ;;  %s217_s26 = scalar_lea.vmem (!%p208_p3), [#allocation4], %s1230_s19 }
  0x36   : > { %1425 = dma.done.wait (%p1915_p6), %s214_s24, 1024  }
  0x37   : > { %1427 = vsyncadd (%p1915_p6), %s214_s24, 4294966272  ;;  %vm796_vm0 = vcmask 146432   ;;  %vm799_vm1 = vcmask 140288   ;;  %v1451_v0 = vmov 0.0   ;;  %v253_v1 = vld [vmem:[%s217_s26 + $0x38] sm:$0xff]  ;;  %v252_v2 = vld [vmem:[%s217_s26 + $0x30] sm:$0xff]  ;;  %v431_v16 = vlaneseq }
  0x38   : > { %325 = vmatprep.mubr.f32.mxu0 %v1451_v0  ;;  %797 = vst.msk [vmem:[#allocation2] sm:$0xff] %vm796_vm0, %v1451_v0  ;;  %798 = vst.msk [vmem:[#allocation2 + $0x8] sm:$0xff] %vm796_vm0, %v1451_v0  ;;  %v251_v3 = vld [vmem:[%s217_s26 + $0x28] sm:$0xff]  ;;  %285 = vmatprep.subr.mxu0 %v253_v1  ;;  %v250_v4 = vld [vmem:[%s217_s26 + $0x20] sm:$0xff]  ;;  %vm254_vm2 = vcmask 261120   ;;  %s1452_s17 = smov 80  }
  0x39   : > { %800 = vst.msk [vmem:[#allocation2 + $0x10] sm:$0x3] %vm799_vm1, %v1451_v0  ;;  %286 = vmatpush1.msra.mxu0 %v252_v2  ;;  %v249_v5 = vld [vmem:[%s217_s26 + $0x18] sm:$0xff]  ;;  %v248_v6 = vld [vmem:[%s217_s26 + $0x10] sm:$0xff]  ;;  %v247_v7 = vld [vmem:[%s217_s26 + $0x8] sm:$0xff]  ;;  %s1453_s27 = smov 112  }
  0x3a   : > { %287 = vmatprep.subr.mxu0 %v251_v3  ;;  %v246_v8 = vld [vmem:[%s217_s26] sm:$0xff]  ;;  %v244_v9 = vld [vmem:[%s1903_s1] sm:$0xff]  ;;  %v245_v10 = vld [vmem:[%s1903_s1 + $0x8] sm:$0x1]  ;;  %s1454_s29 = smov 64   ;;  %s1455_s8 = smov 96  }
  0x3b   : > { %288 = vmatpush1.msra.mxu0 %v250_v4  ;;  %s1456_s9 = smov 32   ;;  %s1457_s10 = smov 48   ;;  %v1459_v14 = vmov 1983009808   ;;  %v432_v19 = vshrl.u32 %v431_v16, 7  ;;  %vm813_vm3 = vcmask 146448  }
  0x3c   : > { %289 = vmatprep.subr.mxu0 %v249_v5  ;;  %s1458_s11 = smov 16   ;;  %v429_v15 = vunpack.c.l.s4 %v1459_v14  ;;  %v1460_v23 = vmov 1934713408   ;;  %s1461_s12 = smov 2   ;;  %vm828_vm4 = vcmask 138248   ;;  %vm835_vm5 = vcmask 130048  }
  0x3d   : > { %290 = vmatpush1.msra.mxu0 %v248_v6  ;;  %v493_v24 = vunpack.c.l.s4 %v1460_v23  ;;  %s1462_s14 = smov 1   ;;  %s908_s19 = sld [smem:[#allocation3]] }
  0x3e   : > { %291 = vmatprep.subr.mxu0 %v247_v7  ;;  %v430_v18 = vunpack.c.0.s8 %v429_v15  ;;  %s1463_s30 = smov 127   ;;  %s1250_s24 = sshll.u32 %s1521_s2, 9 }
  0x3f   : > { %292 = vmatpush1.msra.mxu0 %v246_v8  ;;  %v494_v32 = vunpack.c.0.s8 %v493_v24  ;;  %s1857_s13 = scalar_lea.hbm %s1907_s5, %s1250_s24  ;;  %s1137_s2 = scalar_lea.sflag [#allocation6], %s1597_s18 }
  0x40   : > { %1232 = vmatmul.mubr.msk.f32.vlgmr.msra.gmra.mxu0 %vm254_vm2, %v244_v9  ;;  %v1636_v25 = vsub.s32 %v430_v18, %v432_v19  ;;  %p1916_p12 = scmp.ne.s32.totalorder %s1912_s6, 0  ;;  %s1464_s16 = smov [#allocation7]  }
  0x41   : > { %331 = vmatprep.mubr.f32.mxu0 %v1451_v0  ;;  %v1646_v44 = vsub.s32 %v494_v32, %v432_v19 }
  0x44   : > { %1233 = vmatmul.mubr.msk.f32.gmra.mxu0 %vm254_vm2, %v245_v10 }
 0x100   : > { %v327_v11 = vpop.f32.mrf.mxu0 }
 0x101   : > { %352 = vrot.lane.b32.xlu1 %v327_v11, %s1452_s17  ;;  %340 = vrot.lane.b32.xlu0 %v327_v11, %s1453_s27 }
 0x102   : > { %v1619_v12 = vpop.f32.mrf.mxu0 }
 0x105   : > { %358 = vrot.lane.b32.xlu1 %v327_v11, %s1454_s29  ;;  %346 = vrot.lane.b32.xlu0 %v327_v11, %s1455_s8 }
 0x109   : > { %370 = vrot.lane.b32.xlu1 %v327_v11, %s1456_s9  ;;  %364 = vrot.lane.b32.xlu0 %v327_v11, %s1457_s10 }
 0x10d   : > { %376 = vrot.lane.b32.xlu0 %v327_v11, %s1458_s11  ;;  %384 = vrot.lane.b32.xlu1 %v1619_v12, %s1453_s27 }
 0x111   : > { %390 = vrot.lane.b32.xlu0 %v1619_v12, %s1455_s8  ;;  %396 = vrot.lane.b32.xlu1 %v1619_v12, %s1452_s17 }
 0x115   : > { %402 = vrot.lane.b32.xlu0 %v1619_v12, %s1454_s29  ;;  %408 = vrot.lane.b32.xlu1 %v1619_v12, %s1457_s10 }
 0x119   : > { %414 = vrot.lane.b32.xlu0 %v1619_v12, %s1456_s9  ;;  %420 = vrot.lane.b32.xlu1 %v1619_v12, %s1458_s11 }
 0x173   : > { %v353_v13 = vpop.permute.xlu1 %352  ;;  %v341_v17 = vpop.permute.xlu0 %340 }
 0x174   : > { %v442_v26 = vcombine.low %v341_v17, %v353_v13  ;;  %v443_v30 = vcombine.high %v341_v17, %v353_v13 }
 0x176   : > { %v450_v35 = vrot.slane %v442_v26, %v1636_v25  ;;  %v1644_v41 = vrot.slane %v443_v30, %v1636_v25 }
 0x177   : > { %v359_v20 = vpop.permute.xlu1 %358  ;;  %v347_v21 = vpop.permute.xlu0 %346 }
 0x178   : > { %v426_v22 = vcombine.low %v327_v11, %v347_v21  ;;  %v427_v29 = vcombine.high %v327_v11, %v347_v21 }
 0x17a   : > { %v434_v31 = vrot.slane %v426_v22, %v1636_v25  ;;  %v1641_v38 = vrot.slane %v427_v29, %v1636_v25 }
 0x17b   : > { %v371_v27 = vpop.permute.xlu1 %370  ;;  %v365_v28 = vpop.permute.xlu0 %364 }
 0x17c   : > { %v458_v33 = vcombine.low %v359_v20, %v371_v27  ;;  %v459_v34 = vcombine.high %v359_v20, %v371_v27  ;;  %v490_v42 = vcombine.low %v434_v31, %v450_v35  ;;  %v491_v43 = vcombine.high %v434_v31, %v450_v35 }
 0x17d   : > { %v506_v51 = vcombine.low %v1641_v38, %v1644_v41 }
 0x17e   : > { %v466_v45 = vrot.slane %v458_v33, %v1636_v25  ;;  %v1650_v46 = vrot.slane %v459_v34, %v1636_v25  ;;  %v498_v57 = vrot.slane %v490_v42, %v1646_v44  ;;  %v1664_v59 = vrot.slane %v491_v43, %v1646_v44  ;;  %v1704_v34 = vpop.f32.mrf.mxu0 }
 0x17f   : > { %v377_v36 = vpop.permute.xlu0 %376  ;;  %v385_v37 = vpop.permute.xlu1 %384  ;;  %v1676_v4 = vrot.slane %v506_v51, %v1646_v44 }
 0x180   : > { %v474_v39 = vcombine.low %v365_v28, %v377_v36  ;;  %v475_v40 = vcombine.high %v365_v28, %v377_v36  ;;  %v1717_v42 = vpop.f32.mrf.mxu0 }
 0x182   : > { %v482_v47 = vrot.slane %v474_v39, %v1636_v25  ;;  %v1654_v48 = vrot.slane %v475_v40, %v1636_v25 }
 0x183   : > { %v391_v49 = vpop.permute.xlu0 %390  ;;  %v397_v50 = vpop.permute.xlu1 %396 }
 0x184   : > { %v522_v52 = vcombine.low %v466_v45, %v482_v47  ;;  %v523_v53 = vcombine.high %v466_v45, %v482_v47  ;;  %v538_v54 = vcombine.low %v1650_v46, %v1654_v48  ;;  %v562_v55 = vcombine.low %v1619_v12, %v391_v49 }
 0x185   : > { %v578_v56 = vcombine.low %v385_v37, %v397_v50  ;;  %v563_v62 = vcombine.high %v1619_v12, %v391_v49  ;;  %v579_v63 = vcombine.high %v385_v37, %v397_v50  ;;  %v539_v43 = vcombine.high %v1650_v46, %v1654_v48 }
 0x186   : > { %v530_v58 = vrot.slane %v522_v52, %v1646_v44  ;;  %v1667_v60 = vrot.slane %v523_v53, %v1646_v44  ;;  %v1670_v61 = vrot.slane %v538_v54, %v1646_v44  ;;  %v570_v5 = vrot.slane %v562_v55, %v1636_v25 }
 0x187   : > { %v403_v0 = vpop.permute.xlu0 %402  ;;  %v409_v1 = vpop.permute.xlu1 %408  ;;  %v586_v6 = vrot.slane %v578_v56, %v1636_v25  ;;  %v577_v8 = vrot.slane %v563_v62, %v1636_v25  ;;  %v593_v9 = vrot.slane %v579_v63, %v1636_v25  ;;  %v507_v47 = vcombine.high %v1641_v38, %v1644_v41 }
 0x188   : > { %v554_v2 = vcombine.low %v498_v57, %v530_v58  ;;  %v556_v3 = vcombine.low %v1664_v59, %v1667_v60  ;;  %v559_v7 = vcombine.high %v1676_v4, %v1670_v61  ;;  %v555_v12 = vcombine.high %v498_v57, %v530_v58  ;;  %v801_v57 = vld [vmem:[#allocation2 + $0x2] sm:$0xff] }
 0x189   : > { %v626_v17 = vcombine.low %v570_v5, %v586_v6  ;;  %v627_v18 = vcombine.high %v570_v5, %v586_v6  ;;  %v642_v23 = vcombine.low %v577_v8, %v593_v9  ;;  %v557_v28 = vcombine.high %v1664_v59, %v1667_v60 }
 0x18a   : > { %805 = vrot.lane.b32.xlu0 %v554_v2, %s1461_s12  ;;  %v558_v36 = vcombine.low %v1676_v4, %v1670_v61  ;;  %v553_v50 = vrot.slane %v539_v43, %v1646_v44  ;;  %v521_v46 = vrot.slane %v507_v47, %v1646_v44  ;;  %v643_v51 = vcombine.high %v577_v8, %v593_v9  ;;  %v802_v2 = vld [vmem:[#allocation2 + $0xa] sm:$0xff] }
 0x18b   : > { %v415_v10 = vpop.permute.xlu0 %414  ;;  %v421_v11 = vpop.permute.xlu1 %420  ;;  %v634_v29 = vrot.slane %v626_v17, %v1646_v44  ;;  %v1696_v31 = vrot.slane %v627_v18, %v1646_v44  ;;  %v1707_v35 = vrot.slane %v642_v23, %v1646_v44 }
 0x18c   : > { %v594_v13 = vcombine.low %v403_v0, %v415_v10  ;;  %v595_v14 = vcombine.high %v403_v0, %v415_v10  ;;  %v610_v15 = vcombine.low %v409_v1, %v421_v11  ;;  %v611_v16 = vcombine.high %v409_v1, %v421_v11 }
 0x18d   : > { %v560_v48 = vcombine.low %v521_v46, %v553_v50  ;;  %v657_v53 = vrot.slane %v643_v51, %v1646_v44  ;;  %v561_v56 = vcombine.high %v521_v46, %v553_v50 }
 0x18e   : > { %v602_v19 = vrot.slane %v594_v13, %v1636_v25  ;;  %v609_v20 = vrot.slane %v595_v14, %v1636_v25  ;;  %v618_v21 = vrot.slane %v610_v15, %v1636_v25  ;;  %v625_v22 = vrot.slane %v611_v16, %v1636_v25  ;;  %820 = vrot.lane.b32.xlu0 %v555_v12, %s1462_s14 }
 0x190   : > { %v658_v24 = vcombine.low %v602_v19, %v618_v21  ;;  %v659_v26 = vcombine.high %v602_v19, %v618_v21  ;;  %v674_v27 = vcombine.low %v609_v20, %v625_v22  ;;  %v675_v38 = vcombine.high %v609_v20, %v625_v22 }
 0x192   : > { %842 = vrot.lane.b32.xlu0 %v557_v28, %s1461_s12  ;;  %v666_v30 = vrot.slane %v658_v24, %v1646_v44  ;;  %v1699_v32 = vrot.slane %v659_v26, %v1646_v44  ;;  %v1702_v33 = vrot.slane %v674_v27, %v1646_v44  ;;  %v689_v52 = vrot.slane %v675_v38, %v1646_v44 }
 0x194   : > { %v690_v37 = vcombine.low %v634_v29, %v666_v30  ;;  %v692_v39 = vcombine.low %v1696_v31, %v1699_v32  ;;  %v695_v40 = vcombine.high %v1707_v35, %v1702_v33  ;;  %v691_v45 = vcombine.high %v634_v29, %v666_v30 }
 0x195   : > { %v693_v49 = vcombine.high %v1696_v31, %v1699_v32  ;;  %v694_v41 = vcombine.low %v1707_v35, %v1702_v33  ;;  %v696_v54 = vcombine.low %v657_v53, %v689_v52  ;;  %v697_v55 = vcombine.high %v657_v53, %v689_v52 }
 0x196   : > { %856 = vrot.lane.b32.xlu0 %v558_v36, %s1462_s14  ;;  %807 = vrot.lane.b32.xlu1 %v690_v37, %s1461_s12 }
 0x19a   : > { %822 = vrot.lane.b32.xlu1 %v691_v45, %s1462_s14  ;;  %386 = vrot.lane.b32.xlu0 %v1717_v42, %s1453_s27 }
 0x19e   : > { %844 = vrot.lane.b32.xlu1 %v693_v49, %s1461_s12  ;;  %398 = vrot.lane.b32.xlu0 %v1717_v42, %s1452_s17 }
 0x1a2   : > { %876 = vrot.lane.b32.xlu1 %v560_v48, %s1461_s12  ;;  %410 = vrot.lane.b32.xlu0 %v1717_v42, %s1457_s10 }
 0x1a6   : > { %858 = vrot.lane.b32.xlu1 %v694_v41, %s1462_s14  ;;  %422 = vrot.lane.b32.xlu0 %v1717_v42, %s1458_s11 }
 0x1aa   : > { %392 = vrot.lane.b32.xlu1 %v1717_v42, %s1455_s8  ;;  %342 = vrot.lane.b32.xlu0 %v1704_v34, %s1453_s27 }
 0x1ae   : > { %404 = vrot.lane.b32.xlu1 %v1717_v42, %s1454_s29  ;;  %878 = vrot.lane.b32.xlu0 %v696_v54, %s1461_s12  ;;  %s1231_s12 = sshll.u32 %s1597_s18, 5 }
 0x1b2   : > { %416 = vrot.lane.b32.xlu1 %v1717_v42, %s1456_s9  ;;  %354 = vrot.lane.b32.xlu0 %v1704_v34, %s1452_s17  ;;  %s1386_s17 = sshll.u32 %s1464_s16, 4  ;;  %s1387_s17 = int_to_ptr.vmem [resolvable:$false] %s1386_s17 }
 0x1b3   : > { %s1388_s27 = scalar_lea.vmem %s1387_s17, 1024 }
 0x1b6   : > { %348 = vrot.lane.b32.xlu1 %v1704_v34, %s1455_s8  ;;  %366 = vrot.lane.b32.xlu0 %v1704_v34, %s1457_s10 }
 0x1ba   : > { %360 = vrot.lane.b32.xlu1 %v1704_v34, %s1454_s29  ;;  %378 = vrot.lane.b32.xlu0 %v1704_v34, %s1458_s11 }
 0x1be   : > { %372 = vrot.lane.b32.xlu1 %v1704_v34, %s1456_s9 }
 0x1c2   : > { %892 = vrot.lane.b32.xlu1 %v697_v55, %s1462_s14 }
 0x1c6   : > { %890 = vrot.lane.b32.xlu1 %v561_v56, %s1462_s14  ;;  %s243_s14 = scalar_lea.vmem [#allocation7], %s1231_s12 }
 0x1fc   : > { %v806_v58 = vpop.permute.xlu0 %805 }
 0x1fd   : > { %v811_v62 = vadd.f32 %v806_v58, %v801_v57 }
 0x1ff   : > { %814 = vst.msk [vmem:[#allocation2 + $0x2] sm:$0xff] %vm813_vm3, %v811_v62 }
 0x200   : > { %v821_v63 = vpop.permute.xlu0 %820 }
 0x204   : > { %v843_v0 = vpop.permute.xlu0 %842 }
 0x206   : > { %v816_v1 = vld [vmem:[#allocation2 + $0x2] sm:$0xff] }
 0x207   : > { %v826_v5 = vadd.f32 %v821_v63, %v816_v1 }
 0x208   : > { %v857_v6 = vpop.permute.xlu0 %856  ;;  %v808_v8 = vpop.permute.xlu1 %807 }
 0x209   : > { %829 = vst.msk [vmem:[#allocation2 + $0x2] sm:$0xff] %vm828_vm4, %v826_v5  ;;  %v812_v9 = vadd.f32 %v808_v8, %v802_v2 }
 0x20b   : > { %815 = vst.msk [vmem:[#allocation2 + $0xa] sm:$0xff] %vm813_vm3, %v812_v9 }
 0x20c   : > { %v823_v10 = vpop.permute.xlu1 %822  ;;  %v1769_v11 = vpop.permute.xlu0 %386 }
 0x210   : > { %v831_v12 = vld [vmem:[#allocation2 + $0x2] sm:$0xff]  ;;  %v845_v13 = vpop.permute.xlu1 %844  ;;  %v1774_v16 = vpop.permute.xlu0 %398 }
 0x211   : > { %v833_v14 = vadd.f32 %v831_v12, %v556_v3 }
 0x212   : > { %v817_v15 = vld [vmem:[#allocation2 + $0xa] sm:$0xff] }
 0x213   : > { %836 = vst.msk [vmem:[#allocation2 + $0x2] sm:$0xff] %vm835_vm5, %v833_v14  ;;  %v827_v17 = vadd.f32 %v823_v10, %v817_v15 }
 0x214   : > { %v877_v18 = vpop.permute.xlu1 %876  ;;  %v1778_v19 = vpop.permute.xlu0 %410 }
 0x215   : > { %830 = vst.msk [vmem:[#allocation2 + $0xa] sm:$0xff] %vm828_vm4, %v827_v17 }
 0x218   : > { %v859_v20 = vpop.permute.xlu1 %858  ;;  %v423_v60 = vpop.permute.xlu0 %422 }
 0x21a   : > { %v838_v21 = vld [vmem:[#allocation2 + $0x1] sm:$0xff] }
 0x21b   : > { %v848_v22 = vadd.f32 %v843_v0, %v838_v21 }
 0x21c   : > { %v832_v23 = vld [vmem:[#allocation2 + $0xa] sm:$0xff]  ;;  %v1780_v24 = vpop.permute.xlu1 %392  ;;  %v343_v27 = vpop.permute.xlu0 %342 }
 0x21d   : > { %850 = vst.msk [vmem:[#allocation2 + $0x1] sm:$0xff] %vm813_vm3, %v848_v22  ;;  %v834_v59 = vadd.f32 %v832_v23, %v692_v39  ;;  %v747_v8 = vcombine.low %v1717_v42, %v1780_v24 }
 0x21f   : > { %837 = vst.msk [vmem:[#allocation2 + $0xa] sm:$0xff] %vm835_vm5, %v834_v59  ;;  %v754_v17 = vrot.slane %v747_v8, %v1636_v25 }
 0x220   : > { %v405_v3 = vpop.permute.xlu1 %404  ;;  %v879_v37 = vpop.permute.xlu0 %878 }
 0x224   : > { %v852_v26 = vld [vmem:[#allocation2 + $0x1] sm:$0xff]  ;;  %v417_v28 = vpop.permute.xlu1 %416  ;;  %v355_v47 = vpop.permute.xlu0 %354 }
 0x225   : > { %v862_v29 = vadd.f32 %v857_v6, %v852_v26  ;;  %v706_v52 = vcombine.low %v343_v27, %v355_v47  ;;  %v763_v2 = vcombine.low %v405_v3, %v417_v28  ;;  %v755_v6 = vcombine.low %v1769_v11, %v1774_v16 }
 0x226   : > { %v839_v30 = vld [vmem:[#allocation2 + $0x9] sm:$0xff] }
 0x227   : > { %864 = vst.msk [vmem:[#allocation2 + $0x1] sm:$0xff] %vm828_vm4, %v862_v29  ;;  %v849_v36 = vadd.f32 %v845_v13, %v839_v30  ;;  %v713_v56 = vrot.slane %v706_v52, %v1636_v25  ;;  %v770_v12 = vrot.slane %v763_v2, %v1636_v25  ;;  %v762_v15 = vrot.slane %v755_v6, %v1636_v25 }
 0x228   : > { %v349_v43 = vpop.permute.xlu1 %348  ;;  %v367_v50 = vpop.permute.xlu0 %366 }
 0x229   : > { %851 = vst.msk [vmem:[#allocation2 + $0x9] sm:$0xff] %vm813_vm3, %v849_v36  ;;  %v698_v53 = vcombine.low %v1704_v34, %v349_v43  ;;  %v771_v34 = vcombine.low %v1778_v19, %v423_v60  ;;  %v779_v11 = vcombine.low %v754_v17, %v762_v15 }
 0x22b   : > { %v705_v57 = vrot.slane %v698_v53, %v1636_v25  ;;  %v778_v10 = vrot.slane %v771_v34, %v1636_v25  ;;  %v786_v16 = vrot.slane %v779_v11, %v1646_v44 }
 0x22c   : > { %v361_v39 = vpop.permute.xlu1 %360  ;;  %v379_v51 = vpop.permute.xlu0 %378 }
 0x22d   : > { %v722_v54 = vcombine.low %v367_v50, %v379_v51  ;;  %v730_v1 = vcombine.low %v705_v57, %v713_v56  ;;  %v1033_v50 = vld [vmem:[%s1906_s4] sm:$0xff] }
 0x22e   : > { %v866_v45 = vld [vmem:[#allocation2 + $0x1] sm:$0xff] }
 0x22f   : > { %v868_v31 = vadd.f32 %v866_v45, %v559_v7  ;;  %v729_v58 = vrot.slane %v722_v54, %v1636_v25  ;;  %v737_v9 = vrot.slane %v730_v1, %v1646_v44 }
 0x230   : > { %v853_v32 = vld [vmem:[#allocation2 + $0x9] sm:$0xff]  ;;  %v373_v46 = vpop.permute.xlu1 %372 }
 0x231   : > { %870 = vst.msk [vmem:[#allocation2 + $0x1] sm:$0xff] %vm835_vm5, %v868_v31  ;;  %v863_v49 = vadd.f32 %v859_v20, %v853_v32  ;;  %v714_v4 = vcombine.low %v361_v39, %v373_v46  ;;  %v787_v20 = vcombine.low %v770_v12, %v778_v10  ;;  %v925_v32 = vld [vmem:[%s1905_s3 + $0x8] sm:$0xff]  ;;  %v927_v46 = vld [vmem:[%s1905_s3 + $0x18] sm:$0xff] }
 0x232   : > { %v1034_v39 = vld [vmem:[%s1906_s4 + $0x8] sm:$0xff] }
 0x233   : > { %865 = vst.msk [vmem:[#allocation2 + $0x9] sm:$0xff] %vm828_vm4, %v863_v49  ;;  %v721_v55 = vrot.slane %v714_v4, %v1636_v25  ;;  %v794_v42 = vrot.slane %v787_v20, %v1646_v44  ;;  %v909_v25 = vstv %s908_s19  ;;  %v926_v49 = vld [vmem:[%s1905_s3 + $0x10] sm:$0xff]  ;;  %s1150_s19 = sshll.u32 %s243_s14, 4  ;;  %s1851_s19 = int_to_ptr.vmem [resolvable:$true] %s1150_s19 }
 0x234   : > { %v893_v7 = vpop.permute.xlu1 %892  ;;  %s1382_s15 = scalar_lea.vmem %s1851_s19, 512  ;;  %p1389_p5 = scmp.lt.s32.totalorder %s1851_s19, %s1387_s17 }
 0x235   : > { %v738_v33 = vcombine.low %v721_v55, %v729_v58  ;;  %v795_v22 = vcombine.low %v786_v16, %v794_v42  ;;  %p1383_p11 = scmp.ne.s32.totalorder %s1851_s19, %s1382_s15  ;;  %p1390_p7 = scmp.lt.s32.totalorder %s1388_s27, %s1382_s15 }
 0x237   : > { %v745_v5 = vrot.slane %v738_v33, %v1646_v44  ;;  %v924_v44 = vld [vmem:[%s1905_s3] sm:$0xff]  ;;  %p1384_p13 = pnand %p1383_p11, %p1916_p12  ;;  %p1391_p8 = por %p1390_p7, %p1389_p5 }
 0x238   : > { %v872_v48 = vld [vmem:[#allocation2] sm:$0xff]  ;;  %v891_v63 = vpop.permute.xlu1 %890  ;;  %1267 = vmatprep.mubr.msk.f32.mxu1 %vm835_vm5, %v924_v44 }
 0x239   : > { %v882_v38 = vadd.f32 %v877_v18, %v872_v48  ;;  %v746_v13 = vcombine.low %v737_v9, %v745_v5  ;;  %p1385_p4 = pneg %p1384_p13 }
 0x23a   : > { %v867_v41 = vld [vmem:[#allocation2 + $0x9] sm:$0xff] }
 0x23b   : > { %884 = vst.msk [vmem:[#allocation2] sm:$0xff] %vm813_vm3, %v882_v38  ;;  %v869_v61 = vadd.f32 %v867_v41, %v695_v40  ;;  %p1392_p10 = pnand %p1391_p8, %p1385_p4 }
 0x23d   : > { %871 = vst.msk [vmem:[#allocation2 + $0x9] sm:$0xff] %vm835_vm5, %v869_v61 }
 0x242   : > { %v886_v62 = vld [vmem:[#allocation2] sm:$0xff] }
 0x243   : > { %v896_v35 = vadd.f32 %v891_v63, %v886_v62 }
 0x244   : > { %v873_v40 = vld [vmem:[#allocation2 + $0x8] sm:$0xff] }
 0x245   : > { %v883_v0 = vadd.f32 %v879_v37, %v873_v40  ;;  %898 = vst.msk [vmem:[#allocation2] sm:$0xff] %vm828_vm4, %v896_v35 }
 0x247   : > { %885 = vst.msk [vmem:[#allocation2 + $0x8] sm:$0xff] %vm813_vm3, %v883_v0 }
 0x24c   : > { %v900_v14 = vld [vmem:[#allocation2] sm:$0xff] }
 0x24d   : > { %v902_v18 = vadd.f32 %v900_v14, %v746_v13 }
 0x24e   : > { %v887_v19 = vld [vmem:[#allocation2 + $0x8] sm:$0xff] }
 0x24f   : > { %v897_v21 = vadd.f32 %v893_v7, %v887_v19  ;;  %904 = vst.msk [vmem:[#allocation2] sm:$0xff] %vm835_vm5, %v902_v18 }
 0x251   : > { %899 = vst.msk [vmem:[#allocation2 + $0x8] sm:$0xff] %vm828_vm4, %v897_v21 }
 0x258   : > { %v901_v23 = vld [vmem:[#allocation2 + $0x8] sm:$0xff] }
 0x259   : > { %v903_v24 = vadd.f32 %v901_v23, %v795_v22 }
 0x25b   : > { %905 = vst.msk [vmem:[#allocation2 + $0x8] sm:$0xff] %vm835_vm5, %v903_v24 }
 0x262   : > { %v907_v59 = vld [vmem:[#allocation2 + $0x9] sm:$0xff]  ;;  %v906_v60 = vld [vmem:[#allocation2 + $0x1] sm:$0xff] }
 0x263   : > { %v911_v3 = vadd.f32 %v909_v25, %v907_v59  ;;  %v910_v26 = vadd.f32 %v909_v25, %v906_v60 }
 0x265   : > { %v1235_v27 = vmul.f32 -1.442695, %v911_v3  ;;  %v1234_v28 = vmul.f32 -1.442695, %v910_v26 }
 0x267   : > { %1346 = vpow2.f32 %v1235_v27 }
 0x268   : > { %1348 = vpow2.f32 %v1234_v28 }
 0x274   : > { %v1347_v29 = vpop.eup %1346 }
 0x275   : > { %v1349_v30 = vpop.eup %1348  ;;  %v919_v36 = vadd.f32 1.0, %v1347_v29 }
 0x276   : > { %v918_v37 = vadd.f32 1.0, %v1349_v30 }
 0x277   : > { %1350 = vrcp.f32 %v919_v36 }
 0x278   : > { %1352 = vrcp.f32 %v918_v37 }
 0x284   : > { %v1351_v43 = vpop.eup %1350 }
 0x285   : > { %v1353_v45 = vpop.eup %1352  ;;  %932 = vrot.lane.b32.xlu0 %v1351_v43, %s1463_s30 }
 0x286   : > { %930 = vrot.lane.b32.xlu1 %v1353_v45, %s1463_s30 }
 0x2f7   : > { %v933_v47 = vpop.permute.xlu0 %932 }
 0x2f8   : > { %1263 = vmatprep.subr.mxu1 %v933_v47  ;;  %v931_v31 = vpop.permute.xlu1 %930 }
 0x2f9   : > { %1264 = vmatpush3.msra.mxu1 %v933_v47 }
 0x2fa   : > { %1265 = vmatprep.subr.mxu1 %v931_v31 }
 0x2fb   : > { %1266 = vmatpush3.msra.mxu1 %v931_v31 }
 0x2fc   : > { %1268 = vmatmul.mubr.msk.f32.vlgmr.msra.gmra.mxu1 %vm835_vm5, %v925_v32  ;;  %1273 = vmatprep.subr.mxu1 %v1034_v39 }
 0x2fd   : > { %1270 = vmatprep.mubr.msk.f32.mxu1 %vm835_vm5, %v926_v49  ;;  %1274 = vmatpush3.msra.mxu1 %v1034_v39 }
 0x2fe   : > { %1275 = vmatprep.subr.mxu1 %v1033_v50 }
 0x2ff   : > { %1276 = vmatpush3.msra.mxu1 %v1033_v50 }
 0x300   : > { %1271 = vmatmul.mubr.msk.f32.gmra.mxu1 %vm835_vm5, %v927_v46 }
 0x3bc   : > { %v1269_v48 = vpop.f32.mrf.mxu1 }
 0x3be   : > { %v1014_v38 = vpop.f32.mrf.mxu1 }
 0x3bf   : > { %1277 = vmatprep.mubr.msk.f32.mxu1 %vm835_vm5, %v1014_v38 }
 0x3c0   : > { %v1272_v41 = vpop.f32.mrf.mxu1  ;;  %1278 = vmatmul.mubr.msk.f32.vlgmr.msra.gmra.mxu1 %vm835_vm5, %v1269_v48 }
 0x3c2   : > { %v1024_v51 = vpop.f32.mrf.mxu1 }
 0x3c3   : > { %1280 = vmatprep.mubr.msk.f32.mxu1 %vm835_vm5, %v1024_v51 }
 0x3c4   : > { %1281 = vmatmul.mubr.msk.f32.gmra.mxu1 %vm835_vm5, %v1272_v41 }
 0x480   : > { %v1279_v61 = vpop.f32.mrf.mxu1 }
 0x481   : > { %1133 = vst.msk [vmem:[%s243_s14 + $0x8] sm:$0xff] %vm254_vm2, %v1279_v61 }
 0x482   : > { %v1113_v4 = vpop.f32.mrf.mxu1 }
 0x483   : > { %1132 = vst.msk [vmem:[%s243_s14] sm:$0xff] %vm254_vm2, %v1113_v4 }
 0x484   : > { %v1282_v7 = vpop.f32.mrf.mxu1 }
 0x485   : > { %1135 = vst.msk [vmem:[%s243_s14 + $0x18] sm:$0xff] %vm254_vm2, %v1282_v7 }
 0x486   : > { %v1123_v52 = vpop.f32.mrf.mxu1 }
 0x487   : > { %1134 = vst.msk [vmem:[%s243_s14 + $0x10] sm:$0xff] %vm254_vm2, %v1123_v52 }
 0x488   : > { %1395 = shalt.err (!%p1392_p10)
}
 0x489   : > { %s1396_s29 = scalar_lea.hbm %s1857_s13, 512  ;;  %s1400_s10 = scalar_lea.hbm %s1907_s5, 1024 }
 0x48a   : > { %p1397_p0 = scmp.ne.s32.totalorder %s1857_s13, %s1396_s29  ;;  %p1401_p1 = scmp.lt.s32.totalorder %s1857_s13, %s1907_s5 }
 0x48b   : > { %p1402_p3 = scmp.lt.s32.totalorder %s1400_s10, %s1396_s29 }
 0x48c   : > { %p1398_p2 = pnand %p1397_p0, %p1916_p12 }
 0x48d   : > { %p1403_p6 = por %p1402_p3, %p1401_p1 }
 0x48e   : > { %p1399_p9 = pneg %p1398_p2 }
 0x490   : > { %p1404_p11 = pnand %p1403_p6, %p1399_p9 }
 0x492   : > { %1407 = shalt.err (!%p1404_p11)
}
 0x493   : > { %s1465_s14 = smov 128   ;;  %s1466_s24 = smov 8  }
 0x494   : > { %1285 = dma.vmem_to_hbm [thread:$0]  (%p1916_p12), %s1851_s19, 512, %s1857_s13, %s1137_s2, %s1465_s14, %s1465_s14, %s1466_s24  }
 0x495 PF: > { %s1165_s26 = sand.u32 1, %s1434_s20   ;;  %p1917_p13 = scmp.ne.s32.totalorder %s1913_s7, 0 }
 0x496   : > { %p1918_p4 = scmp.ge.s32.totalorder %s1446_s23, 2  ;;  %s1166_s30 = scalar_lea.sflag [#allocation6], %s1165_s26 }
 0x498   : > { %p1292_p5 = pnand %p1918_p4, %p1917_p13 }
 0x49a   : > { %p1293_p7 = pneg %p1292_p5 }
 0x49c   : > { %1429 = dma.done.wait (%p1293_p7), %s1166_s30, 512  }
 0x49d   : > { %1431 = vsyncadd (%p1293_p7), %s1166_s30, 4294966784  ;;  %p19_p8 = scmp.ge.s32.totalorder %s1525_s25, 4   ;;  %s1919_s20 = smov %s1438_s21 }
 0x49e   : > { %s1920_s21 = smov %s1442_s22  ;;  %s1921_s22 = smov %s1537_s28 }
 0x49f   : > { %s1922_s23 = smov %s1525_s25  ;;  %21 = sbr.rel (!%p19_p8) target bundleno = 7 (0x7), region = 85 }
 0x4a4   :  { %1171 = vsyncpa [#allocation5], 1 }
 0x4a5   :  { %1173 = vsyncpa [#allocation5 + $0x1], 1 }
 0x4a6   :  { %1174 = vsyncpa [#allocation6], 1 }
 0x4a7   :  { %1176 = vsyncpa [#allocation6 + $0x1], 1 }

</bundles_post_ra>
